<compile_context>
chip_gen: v6e
topology: v6e:2x2x1
jax: 0.10.0
libtpu: 0.0.40
codegen_flags: <defaults>
</compile_context>

<pallas_src>
import functools

import jax
import jax.numpy as jnp
from jax import lax
from jax.experimental import pallas as pl
from jax.experimental.pallas import tpu as pltpu

_EPS = 1e-7      # smp DiceLoss eps
# smooth = 0.0 (smp default) is folded in implicitly.


def _custom_loss_kernel(out_ref, tgt_ref, m1_ref, m2_ref, mt_ref, loss_ref,
                        sum_t, sum_p1, sum_p2, int1, int2,
                        *, hw, tile, n_classes, bce_count):
    n = pl.program_id(0)
    s = pl.program_id(1)
    is_first = jnp.logical_and(n == 0, s == 0)
    is_last = jnp.logical_and(n == pl.num_programs(0) - 1,
                              s == pl.num_programs(1) - 1)

    @pl.when(is_first)
    def _init():
        sum_t[...] = jnp.zeros_like(sum_t)
        sum_p1[...] = jnp.zeros_like(sum_p1)
        sum_p2[...] = jnp.zeros_like(sum_p2)
        int1[...] = jnp.zeros_like(int1)
        int2[...] = jnp.zeros_like(int2)

    # ---- per-tile Dice partials (masks streamed once, cast per-tile) ----
    t = mt_ref[...].astype(jnp.float32)                    # (C, tile)
    p1 = jax.nn.sigmoid(m1_ref[...].astype(jnp.float32))   # (C, tile)
    p2 = jax.nn.sigmoid(m2_ref[...].astype(jnp.float32))   # (C, tile)

    if hw % tile != 0:  # static: mask out-of-range lanes of the last tile
        col = lax.broadcasted_iota(jnp.int32, (n_classes, tile), 1) + s * tile
        lane_ok = col < hw
        zero = jnp.float32(0.0)
        t = jnp.where(lane_ok, t, zero)
        p1 = jnp.where(lane_ok, p1, zero)
        p2 = jnp.where(lane_ok, p2, zero)

    sum_t[...] += jnp.sum(t, axis=1, keepdims=True)         # (C, 1)
    sum_p1[...] += jnp.sum(p1, axis=1, keepdims=True)
    sum_p2[...] += jnp.sum(p2, axis=1, keepdims=True)
    int1[...] += jnp.sum(p1 * t, axis=1, keepdims=True)
    int2[...] += jnp.sum(p2 * t, axis=1, keepdims=True)

    @pl.when(is_last)
    def _finalize():
        # BCEWithLogits (mean) on the tiny resident (B, K) blocks, once.
        x = out_ref[...].astype(jnp.float32)
        z = tgt_ref[...].astype(jnp.float32)
        bce = jnp.maximum(x, 0.0) - x * z + jnp.log1p(jnp.exp(-jnp.abs(x)))
        loss1 = jnp.sum(bce) * (1.0 / bce_count)

        ts = sum_t[...]                                      # (C, 1)
        valid = (ts > 0.0).astype(jnp.float32)               # classes present

        def dice(sp_ref, it_ref):
            card = sp_ref[...] + ts
            score = (2.0 * it_ref[...]) / jnp.maximum(card, _EPS)
            return jnp.sum((1.0 - score) * valid) * (1.0 / n_classes)

        loss2 = dice(sum_p1, int1) + dice(sum_p2, int2)
        loss_ref[0, 0] = loss1 + 0.15 * loss2


def custom_loss(outputs, targets, masks_outputs, masks_outputs2, masks_targets):
    """outputs/targets: (B, K); masks_outputs(2): (N, C, H, W);
    masks_targets: (B, T, C, H, W) with N == B*T (matches `.flatten(0, 1)`)."""
    # .flatten(0, 1) and the spatial merge are free reshapes (no HBM pass).
    if masks_targets.dtype == jnp.bool_:
        masks_targets = masks_targets.astype(jnp.float32)  # defensive; usually float
    mt = masks_targets.reshape((-1,) + masks_targets.shape[2:])
    N, C, H, W = masks_outputs.shape
    assert mt.shape == (N, C, H, W)
    hw = H * W

    m1 = masks_outputs.reshape(N, C, hw)
    m2 = masks_outputs2.reshape(N, C, hw)
    mtf = mt.reshape(N, C, hw)

    # Tile the flattened spatial axis: ~6 MiB of mask tiles per grid step
    # (3 inputs x 2 pipeline buffers) => per-step DMA >> 0.35us step overhead
    # while staying far under v5e/v7x scoped-VMEM limits.
    itemsize = max(m1.dtype.itemsize, m2.dtype.itemsize, mtf.dtype.itemsize)
    budget = 6 * 1024 * 1024
    lane_cap = max(128, (budget // (3 * 2 * C * itemsize) // 128) * 128)
    if hw <= lane_cap:
        tile = hw          # single spatial tile; full-dim block always legal
    else:
        tile = lane_cap    # multiple of 128; remainder masked in-kernel
    n_sp = pl.cdiv(hw, tile)

    B, K = outputs.shape
    kernel = functools.partial(
        _custom_loss_kernel,
        hw=hw, tile=tile, n_classes=C, bce_count=float(B * K))

    grid_spec = pltpu.PrefetchScalarGridSpec(
        num_scalar_prefetch=0,
        grid=(N, n_sp),
        in_specs=[
            # tiny logits/labels: untiled, resident in VMEM for the whole grid
            pl.BlockSpec(memory_space=pltpu.MemorySpace.VMEM),   # outputs
            pl.BlockSpec(memory_space=pltpu.MemorySpace.VMEM),   # targets
            # masks: (1, C, tile) blocks in native layout, N-dim squeezed
            pl.BlockSpec((None, C, tile), lambda n, s: (n, 0, s)),  # masks_outputs
            pl.BlockSpec((None, C, tile), lambda n, s: (n, 0, s)),  # masks_outputs2
            pl.BlockSpec((None, C, tile), lambda n, s: (n, 0, s)),  # masks_targets
        ],
        out_specs=pl.BlockSpec(memory_space=pltpu.MemorySpace.SMEM),  # scalar loss
        scratch_shapes=[pltpu.VMEM((C, 1), jnp.float32)] * 5,  # t, p1, p2, i1, i2
    )

    loss = pl.pallas_call(
        kernel,
        out_shape=jax.ShapeDtypeStruct((1, 1), jnp.float32),
        grid_spec=grid_spec,
        compiler_params=pltpu.CompilerParams(
            dimension_semantics=("arbitrary", "arbitrary"),
            vmem_limit_bytes=32 * 1024 * 1024),
    )(outputs, targets, m1, m2, mtf)
    return loss[0, 0]


if __name__ == "__main__":
    key = jax.random.PRNGKey(0)
    k1, k2, k3, k4, k5 = jax.random.split(key, 5)

    B, K = 2, 4                 # classification logits / multilabel targets
    T, C, H, W = 2, 3, 16, 16   # masks: N = B*T frames, C classes, HxW spatial

    outputs = jax.random.normal(k1, (B, K), jnp.float32)
    targets = (jax.random.uniform(k2, (B, K)) > 0.5).astype(jnp.float32)
    # mask logits in bf16: kernel streams them at half the bytes, casts per-tile
    masks_outputs = jax.random.normal(k3, (B * T, C, H, W), jnp.bfloat16)
    masks_outputs2 = jax.random.normal(k4, (B * T, C, H, W), jnp.bfloat16)
    masks_targets = (jax.random.uniform(k5, (B, T, C, H, W)) > 0.5).astype(jnp.float32)

    loss = custom_loss(outputs, targets, masks_outputs, masks_outputs2, masks_targets)
    jax.block_until_ready(loss)
    print("KERNEL_OK")
</pallas_src>

<mosaic_0001>
module attributes {stable_mosaic.version = 11 : i64} {
  func.func @_custom_loss_kernel(%arg0: i32, %arg1: i32, %arg2: memref<2x4xf32, #tpu.memory_space<vmem>>, %arg3: memref<2x4xf32, #tpu.memory_space<vmem>>, %arg4: memref<1x3x256xbf16, #tpu.memory_space<vmem>>, %arg5: memref<1x3x256xbf16, #tpu.memory_space<vmem>>, %arg6: memref<1x3x256xf32, #tpu.memory_space<vmem>>, %arg7: memref<1x1xf32, #tpu.memory_space<smem>>, %arg8: memref<3x1xf32, #tpu.memory_space<vmem>>, %arg9: memref<3x1xf32, #tpu.memory_space<vmem>>, %arg10: memref<3x1xf32, #tpu.memory_space<vmem>>, %arg11: memref<3x1xf32, #tpu.memory_space<vmem>>, %arg12: memref<3x1xf32, #tpu.memory_space<vmem>>) attributes {dimension_semantics = [#tpu.dimension_semantics<arbitrary>, #tpu.dimension_semantics<arbitrary>], iteration_bounds = array<i64: 4, 1>, scalar_prefetch = 0 : i64, scratch_operands = 5 : i64, tpu.core_type = #tpu.core_type<tc>, window_params = [{pipeline_mode = #tpu.pipeline_mode<synchronous>, transform_indices = @transform_0, window_bounds = array<i64: 2, 4>}, {pipeline_mode = #tpu.pipeline_mode<synchronous>, transform_indices = @transform_1, window_bounds = array<i64: 2, 4>}, {transform_indices = @transform_2, window_bounds = array<i64: 1, 3, 256>}, {transform_indices = @transform_3, window_bounds = array<i64: 1, 3, 256>}, {transform_indices = @transform_4, window_bounds = array<i64: 1, 3, 256>}, {transform_indices = @transform_5, window_bounds = array<i64: 1, 1>}]} {
    %c0_i32 = arith.constant 0 : i32
    %0 = arith.cmpi eq, %arg0, %c0_i32 : i32
    %c0_i32_0 = arith.constant 0 : i32
    %1 = arith.cmpi eq, %arg1, %c0_i32_0 : i32
    %2 = arith.andi %0, %1 : i1
    %c3_i32 = arith.constant 3 : i32
    %3 = arith.cmpi eq, %arg0, %c3_i32 : i32
    %c0_i32_1 = arith.constant 0 : i32
    %4 = arith.cmpi eq, %arg1, %c0_i32_1 : i32
    %5 = arith.andi %3, %4 : i1
    %6 = arith.extui %2 : i1 to i32
    %c0_i32_2 = arith.constant 0 : i32
    %7 = arith.cmpi ne, %6, %c0_i32_2 : i32
    scf.if %7 {
      %cst_38 = arith.constant 0.000000e+00 : f32
      %55 = vector.broadcast %cst_38 : f32 to vector<3x1xf32>
      %c0_39 = arith.constant 0 : index
      %c0_40 = arith.constant 0 : index
      %56 = vector.load %arg8[%c0_39, %c0_40] : memref<3x1xf32, #tpu.memory_space<vmem>>, vector<3x1xf32>
      tpu.vector_store %arg8[%c0_39, %c0_40], %55 {strides = array<i32>} : memref<3x1xf32, #tpu.memory_space<vmem>>, vector<3x1xf32>,
      %cst_41 = arith.constant 0.000000e+00 : f32
      %57 = vector.broadcast %cst_41 : f32 to vector<3x1xf32>
      %c0_42 = arith.constant 0 : index
      %c0_43 = arith.constant 0 : index
      %58 = vector.load %arg9[%c0_42, %c0_43] : memref<3x1xf32, #tpu.memory_space<vmem>>, vector<3x1xf32>
      tpu.vector_store %arg9[%c0_42, %c0_43], %57 {strides = array<i32>} : memref<3x1xf32, #tpu.memory_space<vmem>>, vector<3x1xf32>,
      %cst_44 = arith.constant 0.000000e+00 : f32
      %59 = vector.broadcast %cst_44 : f32 to vector<3x1xf32>
      %c0_45 = arith.constant 0 : index
      %c0_46 = arith.constant 0 : index
      %60 = vector.load %arg10[%c0_45, %c0_46] : memref<3x1xf32, #tpu.memory_space<vmem>>, vector<3x1xf32>
      tpu.vector_store %arg10[%c0_45, %c0_46], %59 {strides = array<i32>} : memref<3x1xf32, #tpu.memory_space<vmem>>, vector<3x1xf32>,
      %cst_47 = arith.constant 0.000000e+00 : f32
      %61 = vector.broadcast %cst_47 : f32 to vector<3x1xf32>
      %c0_48 = arith.constant 0 : index
      %c0_49 = arith.constant 0 : index
      %62 = vector.load %arg11[%c0_48, %c0_49] : memref<3x1xf32, #tpu.memory_space<vmem>>, vector<3x1xf32>
      tpu.vector_store %arg11[%c0_48, %c0_49], %61 {strides = array<i32>} : memref<3x1xf32, #tpu.memory_space<vmem>>, vector<3x1xf32>,
      %cst_50 = arith.constant 0.000000e+00 : f32
      %63 = vector.broadcast %cst_50 : f32 to vector<3x1xf32>
      %c0_51 = arith.constant 0 : index
      %c0_52 = arith.constant 0 : index
      %64 = vector.load %arg12[%c0_51, %c0_52] : memref<3x1xf32, #tpu.memory_space<vmem>>, vector<3x1xf32>
      tpu.vector_store %arg12[%c0_51, %c0_52], %63 {strides = array<i32>} : memref<3x1xf32, #tpu.memory_space<vmem>>, vector<3x1xf32>,
    } else {
    }
    %c0 = arith.constant 0 : index
    %c0_3 = arith.constant 0 : index
    %c0_4 = arith.constant 0 : index
    %8 = vector.load %arg6[%c0, %c0_3, %c0_4] : memref<1x3x256xf32, #tpu.memory_space<vmem>>, vector<1x3x256xf32>
    %9 = vector.shape_cast %8 : vector<1x3x256xf32> to vector<3x256xf32>
    %c0_5 = arith.constant 0 : index
    %c0_6 = arith.constant 0 : index
    %c0_7 = arith.constant 0 : index
    %10 = vector.load %arg4[%c0_5, %c0_6, %c0_7] : memref<1x3x256xbf16, #tpu.memory_space<vmem>>, vector<1x3x256xbf16>
    %11 = vector.shape_cast %10 : vector<1x3x256xbf16> to vector<3x256xbf16>
    %12 = arith.extf %11 : vector<3x256xbf16> to vector<3x256xf32>
    %13 = arith.negf %12 : vector<3x256xf32>
    %14 = math.exp %13 : vector<3x256xf32>
    %cst = arith.constant 1.000000e+00 : f32
    %15 = vector.broadcast %cst : f32 to vector<3x256xf32>
    %16 = arith.addf %15, %14 : vector<3x256xf32>
    %17 = arith.divf %15, %16 : vector<3x256xf32>
    %c0_8 = arith.constant 0 : index
    %c0_9 = arith.constant 0 : index
    %c0_10 = arith.constant 0 : index
    %18 = vector.load %arg5[%c0_8, %c0_9, %c0_10] : memref<1x3x256xbf16, #tpu.memory_space<vmem>>, vector<1x3x256xbf16>
    %19 = vector.shape_cast %18 : vector<1x3x256xbf16> to vector<3x256xbf16>
    %20 = arith.extf %19 : vector<3x256xbf16> to vector<3x256xf32>
    %21 = arith.negf %20 : vector<3x256xf32>
    %22 = math.exp %21 : vector<3x256xf32>
    %cst_11 = arith.constant 1.000000e+00 : f32
    %23 = vector.broadcast %cst_11 : f32 to vector<3x256xf32>
    %24 = arith.addf %23, %22 : vector<3x256xf32>
    %25 = arith.divf %23, %24 : vector<3x256xf32>
    %c0_12 = arith.constant 0 : index
    %c0_13 = arith.constant 0 : index
    %26 = vector.load %arg8[%c0_12, %c0_13] : memref<3x1xf32, #tpu.memory_space<vmem>>, vector<3x1xf32>
    %cst_14 = arith.constant dense<0.000000e+00> : vector<3xf32>
    %27 = vector.multi_reduction <add>, %9, %cst_14 [1] : vector<3x256xf32> to vector<3xf32>
    %28 = vector.shape_cast %27 : vector<3xf32> to vector<3x1xf32>
    %29 = arith.addf %26, %28 : vector<3x1xf32>
    %c0_15 = arith.constant 0 : index
    %c0_16 = arith.constant 0 : index
    %30 = vector.load %arg8[%c0_15, %c0_16] : memref<3x1xf32, #tpu.memory_space<vmem>>, vector<3x1xf32>
    tpu.vector_store %arg8[%c0_15, %c0_16], %29 {strides = array<i32>} : memref<3x1xf32, #tpu.memory_space<vmem>>, vector<3x1xf32>,
    %c0_17 = arith.constant 0 : index
    %c0_18 = arith.constant 0 : index
    %31 = vector.load %arg9[%c0_17, %c0_18] : memref<3x1xf32, #tpu.memory_space<vmem>>, vector<3x1xf32>
    %cst_19 = arith.constant dense<0.000000e+00> : vector<3xf32>
    %32 = vector.multi_reduction <add>, %17, %cst_19 [1] : vector<3x256xf32> to vector<3xf32>
    %33 = vector.shape_cast %32 : vector<3xf32> to vector<3x1xf32>
    %34 = arith.addf %31, %33 : vector<3x1xf32>
    %c0_20 = arith.constant 0 : index
    %c0_21 = arith.constant 0 : index
    %35 = vector.load %arg9[%c0_20, %c0_21] : memref<3x1xf32, #tpu.memory_space<vmem>>, vector<3x1xf32>
    tpu.vector_store %arg9[%c0_20, %c0_21], %34 {strides = array<i32>} : memref<3x1xf32, #tpu.memory_space<vmem>>, vector<3x1xf32>,
    %c0_22 = arith.constant 0 : index
    %c0_23 = arith.constant 0 : index
    %36 = vector.load %arg10[%c0_22, %c0_23] : memref<3x1xf32, #tpu.memory_space<vmem>>, vector<3x1xf32>
    %cst_24 = arith.constant dense<0.000000e+00> : vector<3xf32>
    %37 = vector.multi_reduction <add>, %25, %cst_24 [1] : vector<3x256xf32> to vector<3xf32>
    %38 = vector.shape_cast %37 : vector<3xf32> to vector<3x1xf32>
    %39 = arith.addf %36, %38 : vector<3x1xf32>
    %c0_25 = arith.constant 0 : index
    %c0_26 = arith.constant 0 : index
    %40 = vector.load %arg10[%c0_25, %c0_26] : memref<3x1xf32, #tpu.memory_space<vmem>>, vector<3x1xf32>
    tpu.vector_store %arg10[%c0_25, %c0_26], %39 {strides = array<i32>} : memref<3x1xf32, #tpu.memory_space<vmem>>, vector<3x1xf32>,
    %c0_27 = arith.constant 0 : index
    %c0_28 = arith.constant 0 : index
    %41 = vector.load %arg11[%c0_27, %c0_28] : memref<3x1xf32, #tpu.memory_space<vmem>>, vector<3x1xf32>
    %42 = arith.mulf %17, %9 : vector<3x256xf32>
    %cst_29 = arith.constant dense<0.000000e+00> : vector<3xf32>
    %43 = vector.multi_reduction <add>, %42, %cst_29 [1] : vector<3x256xf32> to vector<3xf32>
    %44 = vector.shape_cast %43 : vector<3xf32> to vector<3x1xf32>
    %45 = arith.addf %41, %44 : vector<3x1xf32>
    %c0_30 = arith.constant 0 : index
    %c0_31 = arith.constant 0 : index
    %46 = vector.load %arg11[%c0_30, %c0_31] : memref<3x1xf32, #tpu.memory_space<vmem>>, vector<3x1xf32>
    tpu.vector_store %arg11[%c0_30, %c0_31], %45 {strides = array<i32>} : memref<3x1xf32, #tpu.memory_space<vmem>>, vector<3x1xf32>,
    %c0_32 = arith.constant 0 : index
    %c0_33 = arith.constant 0 : index
    %47 = vector.load %arg12[%c0_32, %c0_33] : memref<3x1xf32, #tpu.memory_space<vmem>>, vector<3x1xf32>
    %48 = arith.mulf %25, %9 : vector<3x256xf32>
    %cst_34 = arith.constant dense<0.000000e+00> : vector<3xf32>
    %49 = vector.multi_reduction <add>, %48, %cst_34 [1] : vector<3x256xf32> to vector<3xf32>
    %50 = vector.shape_cast %49 : vector<3xf32> to vector<3x1xf32>
    %51 = arith.addf %47, %50 : vector<3x1xf32>
    %c0_35 = arith.constant 0 : index
    %c0_36 = arith.constant 0 : index
    %52 = vector.load %arg12[%c0_35, %c0_36] : memref<3x1xf32, #tpu.memory_space<vmem>>, vector<3x1xf32>
    tpu.vector_store %arg12[%c0_35, %c0_36], %51 {strides = array<i32>} : memref<3x1xf32, #tpu.memory_space<vmem>>, vector<3x1xf32>,
    %53 = arith.extui %5 : i1 to i32
    %c0_i32_37 = arith.constant 0 : i32
    %54 = arith.cmpi ne, %53, %c0_i32_37 : i32
    scf.if %54 {
      %c0_38 = arith.constant 0 : index
      %c0_39 = arith.constant 0 : index
      %55 = vector.load %arg2[%c0_38, %c0_39] : memref<2x4xf32, #tpu.memory_space<vmem>>, vector<2x4xf32>
      %c0_40 = arith.constant 0 : index
      %c0_41 = arith.constant 0 : index
      %56 = vector.load %arg3[%c0_40, %c0_41] : memref<2x4xf32, #tpu.memory_space<vmem>>, vector<2x4xf32>
      %cst_42 = arith.constant 0.000000e+00 : f32
      %57 = vector.broadcast %cst_42 : f32 to vector<2x4xf32>
      %58 = arith.maximumf %55, %57 : vector<2x4xf32>
      %59 = arith.mulf %55, %56 : vector<2x4xf32>
      %60 = arith.subf %58, %59 : vector<2x4xf32>
      %61 = math.absf %55 : vector<2x4xf32>
      %cst_43 = arith.constant 0.000000e+00 : f32
      %62 = vector.broadcast %cst_43 : f32 to vector<2x4xf32>
      %63 = arith.subf %62, %61 : vector<2x4xf32>
      %64 = math.exp %63 : vector<2x4xf32>
      %65 = math.log1p %64 : vector<2x4xf32>
      %66 = arith.addf %60, %65 : vector<2x4xf32>
      %67 = vector.shape_cast %66 : vector<2x4xf32> to vector<1x2x4xf32>
      %cst_44 = arith.constant dense<0.000000e+00> : vector<1xf32>
      %68 = vector.multi_reduction <add>, %67, %cst_44 [1, 2] : vector<1x2x4xf32> to vector<1xf32>
      %69 = vector.shape_cast %68 : vector<1xf32> to vector<1x1x1xf32>
      %70 = vector.extract %69[0, 0, 0] : f32 from vector<1x1x1xf32>
      %cst_45 = arith.constant 1.250000e-01 : f32
      %71 = arith.mulf %70, %cst_45 : f32
      %c0_46 = arith.constant 0 : index
      %c0_47 = arith.constant 0 : index
      %72 = vector.load %arg8[%c0_46, %c0_47] : memref<3x1xf32, #tpu.memory_space<vmem>>, vector<3x1xf32>
      %cst_48 = arith.constant 0.000000e+00 : f32
      %73 = vector.broadcast %cst_48 : f32 to vector<3x1xf32>
      %74 = arith.cmpf ogt, %72, %73 : vector<3x1xf32>
      %75 = arith.extui %74 : vector<3x1xi1> to vector<3x1xi32>
      %76 = arith.sitofp %75 : vector<3x1xi32> to vector<3x1xf32>
      %c0_49 = arith.constant 0 : index
      %c0_50 = arith.constant 0 : index
      %77 = vector.load %arg9[%c0_49, %c0_50] : memref<3x1xf32, #tpu.memory_space<vmem>>, vector<3x1xf32>
      %78 = arith.addf %77, %72 : vector<3x1xf32>
      %c0_51 = arith.constant 0 : index
      %c0_52 = arith.constant 0 : index
      %79 = vector.load %arg11[%c0_51, %c0_52] : memref<3x1xf32, #tpu.memory_space<vmem>>, vector<3x1xf32>
      %cst_53 = arith.constant 2.000000e+00 : f32
      %80 = vector.broadcast %cst_53 : f32 to vector<3x1xf32>
      %81 = arith.mulf %80, %79 : vector<3x1xf32>
      %cst_54 = arith.constant 1.000000e-07 : f32
      %82 = vector.broadcast %cst_54 : f32 to vector<3x1xf32>
      %83 = arith.maximumf %78, %82 : vector<3x1xf32>
      %84 = arith.divf %81, %83 : vector<3x1xf32>
      %cst_55 = arith.constant 1.000000e+00 : f32
      %85 = vector.broadcast %cst_55 : f32 to vector<3x1xf32>
      %86 = arith.subf %85, %84 : vector<3x1xf32>
      %87 = arith.mulf %86, %76 : vector<3x1xf32>
      %88 = vector.shape_cast %87 : vector<3x1xf32> to vector<1x3x1xf32>
      %cst_56 = arith.constant dense<0.000000e+00> : vector<1xf32>
      %89 = vector.multi_reduction <add>, %88, %cst_56 [1, 2] : vector<1x3x1xf32> to vector<1xf32>
      %90 = vector.shape_cast %89 : vector<1xf32> to vector<1x1x1xf32>
      %91 = vector.extract %90[0, 0, 0] : f32 from vector<1x1x1xf32>
      %cst_57 = arith.constant 0.333333343 : f32
      %92 = arith.mulf %91, %cst_57 : f32
      %c0_58 = arith.constant 0 : index
      %c0_59 = arith.constant 0 : index
      %93 = vector.load %arg10[%c0_58, %c0_59] : memref<3x1xf32, #tpu.memory_space<vmem>>, vector<3x1xf32>
      %94 = arith.addf %93, %72 : vector<3x1xf32>
      %c0_60 = arith.constant 0 : index
      %c0_61 = arith.constant 0 : index
      %95 = vector.load %arg12[%c0_60, %c0_61] : memref<3x1xf32, #tpu.memory_space<vmem>>, vector<3x1xf32>
      %cst_62 = arith.constant 2.000000e+00 : f32
      %96 = vector.broadcast %cst_62 : f32 to vector<3x1xf32>
      %97 = arith.mulf %96, %95 : vector<3x1xf32>
      %cst_63 = arith.constant 1.000000e-07 : f32
      %98 = vector.broadcast %cst_63 : f32 to vector<3x1xf32>
      %99 = arith.maximumf %94, %98 : vector<3x1xf32>
      %100 = arith.divf %97, %99 : vector<3x1xf32>
      %cst_64 = arith.constant 1.000000e+00 : f32
      %101 = vector.broadcast %cst_64 : f32 to vector<3x1xf32>
      %102 = arith.subf %101, %100 : vector<3x1xf32>
      %103 = arith.mulf %102, %76 : vector<3x1xf32>
      %104 = vector.shape_cast %103 : vector<3x1xf32> to vector<1x3x1xf32>
      %cst_65 = arith.constant dense<0.000000e+00> : vector<1xf32>
      %105 = vector.multi_reduction <add>, %104, %cst_65 [1, 2] : vector<1x3x1xf32> to vector<1xf32>
      %106 = vector.shape_cast %105 : vector<1xf32> to vector<1x1x1xf32>
      %107 = vector.extract %106[0, 0, 0] : f32 from vector<1x1x1xf32>
      %cst_66 = arith.constant 0.333333343 : f32
      %108 = arith.mulf %107, %cst_66 : f32
      %109 = arith.addf %92, %108 : f32
      %cst_67 = arith.constant 1.500000e-01 : f32
      %110 = arith.mulf %cst_67, %109 : f32
      %111 = arith.addf %71, %110 : f32
      %c0_68 = arith.constant 0 : index
      %c0_69 = arith.constant 0 : index
      %112 = memref.load %arg7[%c0_68, %c0_69] : memref<1x1xf32, #tpu.memory_space<smem>>
      memref.store %111, %arg7[%c0_68, %c0_69] : memref<1x1xf32, #tpu.memory_space<smem>>
    } else {
    }
    return
  }
  func.func @transform_0(%arg0: i32, %arg1: i32) -> (i32, i32) {
    %c0_i32 = arith.constant 0 : i32
    %c0_i32_0 = arith.constant 0 : i32
    %c0_i32_1 = arith.constant 0 : i32
    return %c0_i32, %c0_i32_0 : i32, i32
  }
  func.func @transform_1(%arg0: i32, %arg1: i32) -> (i32, i32) {
    %c0_i32 = arith.constant 0 : i32
    %c0_i32_0 = arith.constant 0 : i32
    %c0_i32_1 = arith.constant 0 : i32
    return %c0_i32, %c0_i32_0 : i32, i32
  }
  func.func @transform_2(%arg0: i32, %arg1: i32) -> (i32, i32, i32) {
    %c0_i32 = arith.constant 0 : i32
    %c0_i32_0 = arith.constant 0 : i32
    return %arg0, %c0_i32, %arg1 : i32, i32, i32
  }
  func.func @transform_3(%arg0: i32, %arg1: i32) -> (i32, i32, i32) {
    %c0_i32 = arith.constant 0 : i32
    %c0_i32_0 = arith.constant 0 : i32
    return %arg0, %c0_i32, %arg1 : i32, i32, i32
  }
  func.func @transform_4(%arg0: i32, %arg1: i32) -> (i32, i32, i32) {
    %c0_i32 = arith.constant 0 : i32
    %c0_i32_0 = arith.constant 0 : i32
    return %arg0, %c0_i32, %arg1 : i32, i32, i32
  }
  func.func @transform_5(%arg0: i32, %arg1: i32) -> (i32, i32) {
    %c0_i32 = arith.constant 0 : i32
    %c0_i32_0 = arith.constant 0 : i32
    %c0_i32_1 = arith.constant 0 : i32
    return %c0_i32, %c0_i32_0 : i32, i32
  }
}

</mosaic_0001>

<bundles_post_ra>
// kernel: tpu_custom_call.1
= control target key start
LH: loop header
LB: loop body
LE: loop exit
PB: predicated region body
PF: predicated region fallthrough
CT: control target
= control target key end

     0   :  { %10 = vsyncpa [#allocation8], 0  ;;  %s731_s18 = smov 0   ;;  %s733_s19 = smov 0   ;;  %s804_s0 = inlined_call_operand.vmem [shape: f32[2,4], index: 0, kind: input, shape index: {}]   ;;  %s805_s1 = inlined_call_operand.vmem [shape: f32[2,4], index: 1, kind: input, shape index: {}]   ;;  %s806_s2 = inlined_call_operand.vmem [shape: bf16[4,3,256], index: 2, kind: input, shape index: {}]   ;;  %s807_s3 = inlined_call_operand.vmem [shape: bf16[4,3,256], index: 3, kind: input, shape index: {}]   ;;  %s808_s4 = inlined_call_operand.vmem [shape: f32[4,3,256], index: 4, kind: input, shape index: {}]   ;;  %s809_s5 = inlined_call_operand.hbm [shape: f32[1,1], index: 5, kind: output, shape index: {}]  }
   0x1   :  { %s735_s20 = smov 0  }
   0x2 LB: > { %s580_s21 = sadd.s32 4294967295, %s696_s20   ;;  %s28_s22 = sadd.s32 1, %s692_s19  ;;  %s696_s20 = sphi %s735_s20, %s16_s20   ;;  %s692_s19 = sphi %s733_s19, %s811_s19   ;;  %s688_s18 = sphi %s731_s18, %s810_s18  }
   0x3   : > { %p30_p0 = scmp.ge.s32.totalorder %s28_s22, 4  ;;  %p583_p1 = scmp.ge.s32.totalorder %s696_s20, 1 }
   0x4   : > { %p236_p2 = scmp.lt.s32.totalorder %s696_s20, 5 }
   0x5   : > { %s813_s22 = smov (%p30_p0, %s28_s22), 0 }
   0x6   : > { %p237_p3 = pnand %p583_p1, %p236_p2 }
   0x7   : > { %p282_p4 = scmp.lt.s32.totalorder (!%p237_p3), %s688_s18, 3  ;;  %p311_p5 = scmp.eq.s32.totalorder (!%p237_p3), %s688_s18, 0 }
   0x8   : > { %240 = sbr.rel (%p237_p3) target bundleno = 469 (0x1d5), region = 40  ;;  %p315_p6 = scmp.eq.s32.totalorder (!%p237_p3), %s688_s18, 3 }
   0xd   : > { %s283_s23 = scalar_select %p282_p4, %s688_s18, 3  ;;  %vm320_vm0 = vcmask (%p311_p5), 2048   ;;  %v698_v0 = vmov (%p311_p5), 0.0  }
   0xe   : > { %319 = sbr.rel (!%p311_p5) target bundleno = 19 (0x13), region = 44  ;;  %321 = vst.msk [vmem:[#allocation2] sm:$0x7] (%p311_p5), %vm320_vm0, %v698_v0  ;;  %322 = vst.msk [vmem:[#allocation3] sm:$0x7] (%p311_p5), %vm320_vm0, %v698_v0 }
   0xf   : > { %s599_s24 = sshll.u32 %s283_s23, 2  ;;  %s601_s25 = sshll.u32 %s283_s23, 3  ;;  %323 = vst.msk [vmem:[#allocation4] sm:$0x7] (%p311_p5), %vm320_vm0, %v698_v0  ;;  %324 = vst.msk [vmem:[#allocation5] sm:$0x7] (%p311_p5), %vm320_vm0, %v698_v0 }
  0x10   : > { %s289_s28 = scalar_lea.vmem %s806_s2, %s599_s24  ;;  %s299_s6 = scalar_lea.vmem %s807_s3, %s599_s24  ;;  %325 = vst.msk [vmem:[#allocation6] sm:$0x7] (%p311_p5), %vm320_vm0, %v698_v0 }
  0x11   : > { %s309_s9 = scalar_lea.vmem %s808_s4, %s601_s25 }
  0x13 PF: > { %v326_v1 = vld [vmem:[%s309_s9] sm:$0x77]  ;;  %vm347_vm1 = vcmask 1042432   ;;  %vm354_vm2 = vcmask 2048   ;;  %vm423_vm5 = vcmask (%p315_p6), 25600  }
  0x14   : > { %v335_v2 = vld [vmem:[%s299_s6] sm:$0xf]  ;;  %v345_v3 = vcombine.high %v326_v1, %v326_v1  ;;  %v348_v4 = vsel %vm347_vm1, %v326_v1, 0.0 }
  0x15   : > { %v336_v5 = vunpack.c.l.bf16 %v335_v2  ;;  %v327_v6 = vld [vmem:[%s289_s28] sm:$0xf]  ;;  %v356_v40 = vld [vmem:[#allocation3] sm:$0x7]  ;;  %v699_v2 = vmov (%p315_p6), 0.0  }
  0x16   : > { %v328_v7 = vunpack.c.l.bf16 %v327_v6  ;;  %v349_v8 = vsel %vm347_vm1, %v345_v3, 0.0  ;;  %v343_v36 = vld [vmem:[#allocation2] sm:$0x7]  ;;  %v367_v39 = vld [vmem:[#allocation4] sm:$0x7] }
  0x17   : > { %v593_v9 = vmul.f32 -1.442695, %v336_v5  ;;  %v350_v10 = vadd.f32 %v349_v8, %v348_v4  ;;  %v378_v45 = vld [vmem:[#allocation5] sm:$0x7]  ;;  %v390_v46 = vld [vmem:[#allocation6] sm:$0x7] }
  0x18   : > { %v592_v11 = vmul.f32 -1.442695, %v328_v7  ;;  %v404_v54 = vld [vmem:[%s804_s0] sm:$0x3] (%p315_p6) }
  0x19   : > { %644 = vpow2.f32 %v593_v9  ;;  %351 = vadd.xlane.f32.xlu0 %v350_v10  ;;  %v409_v55 = vand.u32 (%p315_p6), 2147483647, %v404_v54 }
  0x1a   : > { %646 = vpow2.f32 %v592_v11 }
  0x1b   : > { %v410_v57 = vsub.f32 (%p315_p6), 0.0, %v409_v55 }
  0x1d   : > { %v411_v59 = vmul.f32 (%p315_p6), 1.442695, %v410_v57 }
  0x26   : > { %v645_v12 = vpop.eup %644 }
  0x27   : > { %v647_v13 = vpop.eup %646  ;;  %v340_v14 = vadd.f32 1.0, %v645_v12 }
  0x28   : > { %v332_v15 = vadd.f32 1.0, %v647_v13  ;;  %v405_v13 = vld [vmem:[%s805_s1] sm:$0x3] (%p315_p6) }
  0x29   : > { %648 = vrcp.f32 %v340_v14 }
  0x2a   : > { %650 = vrcp.f32 %v332_v15  ;;  %v406_v15 = vmax.f32 (%p315_p6), %v404_v54, 0.0 }
  0x36   : > { %v649_v16 = vpop.eup %648 }
  0x37   : > { %v651_v17 = vpop.eup %650  ;;  %v369_v18 = vcombine.high %v649_v16, %v649_v16  ;;  %v371_v19 = vsel %vm347_vm1, %v649_v16, 0.0  ;;  %v391_v20 = vmul.f32 %v649_v16, %v326_v1  ;;  %v407_v16 = vmul.f32 (%p315_p6), %v405_v13, %v404_v54 }
  0x38   : > { %v358_v21 = vcombine.high %v651_v17, %v651_v17  ;;  %v360_v22 = vsel %vm347_vm1, %v651_v17, 0.0  ;;  %v379_v23 = vmul.f32 %v651_v17, %v326_v1 }
  0x39   : > { %v372_v24 = vsel %vm347_vm1, %v369_v18, 0.0  ;;  %v393_v25 = vcombine.high %v391_v20, %v391_v20  ;;  %v395_v26 = vsel %vm347_vm1, %v391_v20, 0.0 }
  0x3a   : > { %v373_v27 = vadd.f32 %v372_v24, %v371_v19  ;;  %v361_v28 = vsel %vm347_vm1, %v358_v21, 0.0  ;;  %v381_v29 = vcombine.high %v379_v23, %v379_v23  ;;  %v383_v30 = vsel %vm347_vm1, %v379_v23, 0.0 }
  0x3b   : > { %v362_v31 = vadd.f32 %v361_v28, %v360_v22  ;;  %v396_v32 = vsel %vm347_vm1, %v393_v25, 0.0  ;;  %v408_v21 = vsub.f32 (%p315_p6), %v406_v15, %v407_v16 }
  0x3c   : > { %374 = vadd.xlane.f32.xlu1 %v373_v27  ;;  %v384_v33 = vsel %vm347_vm1, %v381_v29, 0.0  ;;  %v397_v35 = vadd.f32 %v396_v32, %v395_v26 }
  0x3d   : > { %363 = vadd.xlane.f32.xlu0 %v362_v31  ;;  %v385_v34 = vadd.f32 %v384_v33, %v383_v30 }
  0x40   : > { %386 = vadd.xlane.f32.xlu1 %v385_v34 }
  0x41   : > { %398 = vadd.xlane.f32.xlu0 %v397_v35 }
  0xa2   : > { %v352_v37 = vpop.xlane.xlu0 %351 }
  0xa3   : > { %v353_v38 = vadd.f32 %v352_v37, %v343_v36 }
  0xa5   : > { %355 = vst.msk [vmem:[#allocation2] sm:$0x7] %vm354_vm2, %v353_v38 }
  0xac   : > { %v435_v51 = vld [vmem:[#allocation2] sm:$0x7] (%p315_p6) }
  0xad   : > { %vm436_vm3 = vcmp.gt.f32.partialorder (%p315_p6), %v435_v51, 0.0 }
  0xae   : > { %v594_v3 = vsel (%p315_p6), %vm436_vm3, 1.0, %v699_v2 }
  0xc5   : > { %v375_v41 = vpop.xlane.xlu1 %374 }
  0xc6   : > { %v376_v42 = vadd.f32 %v375_v41, %v367_v39  ;;  %v364_v43 = vpop.xlane.xlu0 %363 }
  0xc7   : > { %v365_v44 = vadd.f32 %v364_v43, %v356_v40 }
  0xc8   : > { %377 = vst.msk [vmem:[#allocation4] sm:$0x7] %vm354_vm2, %v376_v42 }
  0xc9   : > { %366 = vst.msk [vmem:[#allocation3] sm:$0x7] %vm354_vm2, %v365_v44  ;;  %v387_v47 = vpop.xlane.xlu1 %386  ;;  %403 = sbr.rel (!%p315_p6) target bundleno = 463 (0x1cf), region = 48 }
  0xca   : > { %v388_v48 = vadd.f32 %v387_v47, %v378_v45  ;;  %v399_v49 = vpop.xlane.xlu0 %398 }
  0xcb   : > { %v400_v50 = vadd.f32 %v399_v49, %v390_v46 }
  0xcc   : > { %389 = vst.msk [vmem:[#allocation5] sm:$0x7] %vm354_vm2, %v388_v48 }
  0xcd   : > { %401 = vst.msk [vmem:[#allocation6] sm:$0x7] %vm354_vm2, %v400_v50 }
  0xcf   : > { %v459_v52 = vld [vmem:[#allocation4] sm:$0x7] }
  0xd0   : > { %v460_v53 = vadd.f32 %v459_v52, %v435_v51  ;;  %v439_v58 = vld [vmem:[#allocation3] sm:$0x7] }
  0xd1   : > { %v440_v60 = vadd.f32 %v439_v58, %v435_v51 }
  0xd2   : > { %v463_v56 = vmax.f32 %v460_v53, 1e-07 }
  0xd3   : > { %v443_v62 = vmax.f32 %v440_v60, 1e-07  ;;  %v441_v9 = vld [vmem:[#allocation5] sm:$0x7] }
  0xd4   : > { %652 = vrcp.f32 %v463_v56  ;;  %v461_v61 = vld [vmem:[#allocation6] sm:$0x7]  ;;  %v442_v11 = vmul.f32 2.0, %v441_v9 }
  0xd5   : > { %654 = vpow2.f32 %v411_v59  ;;  %v462_v63 = vmul.f32 2.0, %v461_v61 }
  0xd6   : > { %656 = vrcp.f32 %v443_v62 }
  0xe1   : > { %v653_v0 = vpop.eup %652 }
  0xe2   : > { %v465_v1 = vmul.f32 %v653_v0, %v462_v63  ;;  %v655_v4 = vpop.eup %654 }
  0xe3   : > { %v413_v6 = vadd.f32 1.0, %v655_v4  ;;  %v416_v10 = vmul.f32 -0.5, %v655_v4  ;;  %v657_v12 = vpop.eup %656  ;;  %v419_v17 = vand.u32 2147483647, %v655_v4 }
  0xe4   : > { %v466_v5 = vsub.f32 1.0, %v465_v1  ;;  %v445_v18 = vmul.f32 %v657_v12, %v442_v11 }
  0xe5   : > { %658 = vlog2.f32 %v413_v6  ;;  %v417_v14 = vadd.f32 1.0, %v416_v10  ;;  %vm420_vm4 = vcmp.lt.f32.partialorder %v419_v17, 0.0004427343 }
  0xe6   : > { %v467_v7 = vmul.f32 %v594_v3, %v466_v5  ;;  %v446_v22 = vsub.f32 1.0, %v445_v18 }
  0xe7   : > { %v418_v19 = vmul.f32 %v655_v4, %v417_v14 }
  0xe8   : > { %v468_v8 = vsel %vm354_vm2, %v467_v7, 0.0  ;;  %v447_v26 = vmul.f32 %v594_v3, %v446_v22 }
  0xe9   : > { %469 = vadd.xlane.f32.xlu1 %v468_v8 }
  0xea   : > { %v448_v28 = vsel %vm354_vm2, %v447_v26, 0.0 }
  0xf2   : > { %v659_v20 = vpop.eup %658 }
  0xf3   : > { %v415_v23 = vmul.f32 0.6931472, %v659_v20 }
  0xf5   : > { %v421_v24 = vsel %vm420_vm4, %v418_v19, %v415_v23 }
  0xf6   : > { %v422_v25 = vadd.f32 %v421_v24, %v408_v21 }
  0xf8   : > { %v424_v27 = vsel %vm423_vm5, %v422_v25, 0.0 }
  0xf9   : > { %425 = vadd.xlane.f32.xlu0 %v424_v27 }
  0xfd   : > { %449 = vadd.xlane.f32.xlu0 %v448_v28 }
 0x172   : > { %v470_v29 = vpop.xlane.xlu1 %469 }
 0x173   : > { %v471_v30 = vrot.slane %v470_v29, 4 }
 0x175   : > { %v472_v31 = vadd.f32 %v471_v30, %v470_v29 }
 0x177   : > { %v473_v35 = vrot.slane %v472_v31, 2 }
 0x179   : > { %v474_v41 = vadd.f32 %v473_v35, %v472_v31 }
 0x17b   : > { %v475_v46 = vrot.slane %v474_v41, 1 }
 0x17d   : > { %v476_v49 = vadd.f32 %v475_v46, %v474_v41 }
 0x182   : > { %v426_v32 = vpop.xlane.xlu0 %425 }
 0x183   : > { %v427_v33 = vrot.slane %v426_v32, 4 }
 0x185   : > { %v428_v34 = vadd.f32 %v427_v33, %v426_v32 }
 0x186   : > { %v450_v36 = vpop.xlane.xlu0 %449 }
 0x187   : > { %v429_v37 = vrot.slane %v428_v34, 2  ;;  %v451_v38 = vrot.slane %v450_v36, 4 }
 0x189   : > { %v452_v39 = vadd.f32 %v451_v38, %v450_v36  ;;  %v430_v40 = vadd.f32 %v429_v37, %v428_v34 }
 0x18b   : > { %v453_v42 = vrot.slane %v452_v39, 2  ;;  %v431_v43 = vrot.slane %v430_v40, 1 }
 0x18d   : > { %v454_v44 = vadd.f32 %v453_v42, %v452_v39  ;;  %v432_v45 = vadd.f32 %v431_v43, %v430_v40 }
 0x18f   : > { %604 = vpush %v432_v45  ;;  %v455_v47 = vrot.slane %v454_v44, 1 }
 0x191   : > { %v456_v48 = vadd.f32 %v455_v47, %v454_v44 }
 0x193   : > { %606 = vpush %v456_v48 }
 0x194   : > { %608 = vpush %v476_v49 }
 0x1c0   : > { %s605_s14 = spop %604 }
 0x1c1   : > { %s434_s24 = smul.f32 0.125, %s605_s14 }
 0x1c4   : > { %s607_s15 = spop %606 }
 0x1c5   : > { %s458_s16 = smul.f32 0.33333334, %s607_s15  ;;  %s609_s17 = spop %608 }
 0x1c6   : > { %s478_s18 = smul.f32 0.33333334, %s609_s17 }
 0x1c8   : > { %s479_s23 = sadd.f32 %s478_s18, %s458_s16 }
 0x1ca   : > { %s480_s25 = smul.f32 0.15, %s479_s23 }
 0x1cc   : > { %s481_s26 = sadd.f32 %s480_s25, %s434_s24 }
 0x1ce   : > { %483 = sst [smem:[#allocation7]] %s481_s26 }
 0x1cf PF: > { %p614_p7 = scmp.eq.s32.totalorder %s580_s21, 3  ;;  %s700_s27 = smov [#allocation7]  }
 0x1d1   : > { %611 = dma.smem_to_hbm (%p614_p7), %s700_s27, 16, %s809_s5, [#allocation8]  }
 0x1d2   : > { %683 = dma.done.wait (%p614_p7), [#allocation8], 16  }
 0x1d3   : > { %685 = vsyncadd (%p614_p7), [#allocation8], 4294967280 }
 0x1d4   : > { %497 = sfence }
 0x1d5 PF: > { %s16_s20 = sadd.s32 1, %s696_s20   ;;  %s810_s18 = smov %s692_s19 }
 0x1d6   : > { %p13_p8 = scmp.ge.s32.totalorder %s16_s20, 6   ;;  %s811_s19 = smov %s813_s22 }
 0x1d8   :  { %15 = sbr.rel (!%p13_p8) target bundleno = 2 (0x2), region = 82 }
 0x1dd   :  { %503 = vsyncpa [#allocation8], 1 }
 0x1de   :  { %505 = vsyncpa [#allocation8 + $0x1], 1 }

</bundles_post_ra>
